<compile_context>
chip_gen: v6e
topology: v6e:2x2x1
jax: 0.10.0
libtpu: 0.0.40
codegen_flags: <defaults>
</compile_context>

<pallas_src>
import functools

import numpy as np
import jax
import jax.numpy as jnp
from jax import lax
from jax.experimental import pallas as pl
from jax.experimental.pallas import tpu as pltpu

_LANES = 128


def _cdiv(a, b):
    return -(-a // b)


# --------------------------------------------------------------------------- #
# Pallas kernel                                                                #
# --------------------------------------------------------------------------- #
def _inv_leaky_relu_kernel(x_ref, y_ref, logdet_ref, *,
                           negative_slope, log_slope, n_valid, need_mask):
    li = pl.program_id(1)                      # lane-tile step (inner, "arbitrary")

    @pl.when(li == 0)
    def _():
        logdet_ref[...] = jnp.zeros_like(logdet_ref)

    x = x_ref[...]                             # (TB, TILE), native dtype
    # Leaky-ReLU in the input dtype; store directly in the output dtype.
    y_ref[...] = jnp.where(x > 0, x, x * negative_slope).astype(y_ref.dtype)

    # Per-batch count of non-activated elements in this tile (f32, in-vreg).
    neg = x <= 0
    if need_mask:
        tile = x_ref.shape[1]
        col = lax.broadcasted_iota(jnp.int32, neg.shape, dimension=1)
        neg = jnp.logical_and(neg, col < (n_valid - li * tile))   # mask OOB lanes
    logdet_ref[...] += jnp.sum(neg.astype(jnp.float32), axis=1, keepdims=True)

    # Finalize: scale the accumulated count by log(negative_slope) once.
    @pl.when(li == pl.num_programs(1) - 1)
    def _():
        logdet_ref[...] = logdet_ref[...] * log_slope


# --------------------------------------------------------------------------- #
# Wrapper: layout plumbing (free reshapes only) + pallas_call                  #
# --------------------------------------------------------------------------- #
def inv_leaky_relu_forward(x, negative_slope=0.01, *,
                           vmem_budget_bytes=12 * 1024 * 1024):
    """x: (B, ...) -> (leaky_relu(x) in x's dtype/shape, log_det (B,) float32)."""
    assert negative_slope > 0.0
    orig_shape = x.shape
    B = int(orig_shape[0])
    N = 1
    for d in orig_shape[1:]:
        N *= int(d)
    # f32 count accumulation is exact only up to 2^24 per batch row.
    assert N <= (1 << 24), "per-batch element count exceeds exact f32 range"

    x2 = x.reshape(B, N)                       # contiguous view, native dtype
    itemsize = x2.dtype.itemsize

    # Batch tile: divides B exactly and satisfies the sublane constraint
    # (equal to the full batch dim, or a multiple of 8).
    TB = 8 if (B % 8 == 0 and B > 8) else B
    n_batch_tiles = B // TB

    # Lane tile from the pipeline-VMEM budget: 2 input + 2 output buffers/step.
    per_lane_bytes = TB * 2 * (itemsize + itemsize)
    max_tile = max(_LANES, (vmem_budget_bytes // per_lane_bytes) // _LANES * _LANES)
    if N <= max_tile:
        tile, n_lane_tiles = N, 1              # full-row block, never ragged
    else:
        n_lane_tiles = _cdiv(N, max_tile)
        tile = _cdiv(_cdiv(N, n_lane_tiles), _LANES) * _LANES     # balanced tiles
        n_lane_tiles = _cdiv(N, tile)
    need_mask = (N % tile) != 0                # only the last lane tile is ragged

    kernel = functools.partial(
        _inv_leaky_relu_kernel,
        negative_slope=float(negative_slope),
        log_slope=float(np.log(negative_slope)),
        n_valid=N,
        need_mask=need_mask,
    )

    y2, logdet = pl.pallas_call(
        kernel,
        out_shape=(
            jax.ShapeDtypeStruct((B, N), x2.dtype),
            jax.ShapeDtypeStruct((B, 1), jnp.float32),
        ),
        grid=(n_batch_tiles, n_lane_tiles),
        in_specs=[pl.BlockSpec((TB, tile), lambda bi, li: (bi, li))],
        out_specs=(
            pl.BlockSpec((TB, tile), lambda bi, li: (bi, li)),
            pl.BlockSpec((TB, 1), lambda bi, li: (bi, 0)),   # carried accumulator
        ),
        compiler_params=pltpu.CompilerParams(
            # Batch axis can shard across TensorCores; the lane axis carries
            # the log-det accumulator, so it must stay sequential.
            dimension_semantics=("parallel", "arbitrary"),
        ),
    )(x2)

    return y2.reshape(orig_shape), logdet[:, 0]


# --------------------------------------------------------------------------- #
# Pure-JAX reference for verification                                          #
# --------------------------------------------------------------------------- #
def inv_leaky_relu_reference(x, negative_slope=0.01):
    y = jnp.where(x > 0, x, x * negative_slope)
    B = x.shape[0]
    n = jnp.sum((x.reshape(B, -1) <= 0).astype(jnp.float32), axis=1)
    return y, n * np.float32(np.log(negative_slope))


def _check(y, ld, y_ref, ld_ref):
    np.testing.assert_allclose(np.asarray(y.astype(jnp.float32)),
                               np.asarray(y_ref.astype(jnp.float32)),
                               rtol=1e-6, atol=1e-6)
    np.testing.assert_allclose(np.asarray(ld), np.asarray(ld_ref),
                               rtol=1e-6, atol=1e-6)


# --------------------------------------------------------------------------- #
if __name__ == "__main__":
    key = jax.random.PRNGKey(0)
    k0, k1, k2, k3 = jax.random.split(key, 4)

    # 1. Primary shape implied by the module usage: (batch, channels, H, W).
    x = jax.random.normal(k0, (2, 4, 16, 16), jnp.float32)
    y, ld = inv_leaky_relu_forward(x, 0.01)
    jax.block_until_ready((y, ld))
    _check(y, ld, *inv_leaky_relu_reference(x, 0.01))

    # 2. Non-128-aligned feature count: single full-row block, no padding.
    xb = jax.random.normal(k1, (2, 3, 5, 7), jnp.float32)
    yb, lb = inv_leaky_relu_forward(xb, 0.2)
    jax.block_until_ready((yb, lb))
    _check(yb, lb, *inv_leaky_relu_reference(xb, 0.2))

    # 3. Multi-tile path: tiny VMEM budget forces a 4-step lane grid with the
    #    carried log-det accumulator (tiles divide N evenly).
    xc = jax.random.normal(k2, (2, 8, 32, 32), jnp.float32)
    yc, lc = inv_leaky_relu_forward(xc, 0.01, vmem_budget_bytes=64 * 1024)
    jax.block_until_ready((yc, lc))
    _check(yc, lc, *inv_leaky_relu_reference(xc, 0.01))

    # 4. Ragged multi-tile path + native bf16 streaming: last lane tile is
    #    partially out-of-bounds, exercising the in-kernel count mask and the
    #    clipped output writeback.
    xd = jax.random.normal(k3, (2, 5, 13, 7), jnp.bfloat16)
    yd, ldd = inv_leaky_relu_forward(xd, 0.1, vmem_budget_bytes=4 * 1024)
    jax.block_until_ready((yd, ldd))
    _check(yd, ldd, *inv_leaky_relu_reference(xd, 0.1))

    print("KERNEL_OK")
</pallas_src>

<mosaic_0001>
module attributes {stable_mosaic.version = 11 : i64} {
  func.func @_inv_leaky_relu_kernel(%arg0: i32, %arg1: i32, %arg2: memref<2x1024xf32, #tpu.memory_space<vmem>>, %arg3: memref<2x1024xf32, #tpu.memory_space<vmem>>, %arg4: memref<2x1xf32, #tpu.memory_space<vmem>>) attributes {dimension_semantics = [#tpu.dimension_semantics<parallel>, #tpu.dimension_semantics<arbitrary>], iteration_bounds = array<i64: 1, 1>, scalar_prefetch = 0 : i64, scratch_operands = 0 : i64, tpu.core_type = #tpu.core_type<tc>, window_params = [{transform_indices = @transform_0, window_bounds = array<i64: 2, 1024>}, {transform_indices = @transform_1, window_bounds = array<i64: 2, 1024>}, {transform_indices = @transform_2, window_bounds = array<i64: 2, 1>}]} {
    %c0_i32 = arith.constant 0 : i32
    %0 = arith.cmpi eq, %arg1, %c0_i32 : i32
    %1 = arith.extui %0 : i1 to i32
    %c0_i32_0 = arith.constant 0 : i32
    %2 = arith.cmpi ne, %1, %c0_i32_0 : i32
    scf.if %2 {
      %cst_13 = arith.constant 0.000000e+00 : f32
      %22 = vector.broadcast %cst_13 : f32 to vector<2x1xf32>
      %c0_14 = arith.constant 0 : index
      %c0_15 = arith.constant 0 : index
      %23 = vector.load %arg4[%c0_14, %c0_15] : memref<2x1xf32, #tpu.memory_space<vmem>>, vector<2x1xf32>
      tpu.vector_store %arg4[%c0_14, %c0_15], %22 {strides = array<i32>} : memref<2x1xf32, #tpu.memory_space<vmem>>, vector<2x1xf32>,
    } else {
    }
    %c0 = arith.constant 0 : index
    %c0_1 = arith.constant 0 : index
    %3 = vector.load %arg2[%c0, %c0_1] : memref<2x1024xf32, #tpu.memory_space<vmem>>, vector<2x1024xf32>
    %cst = arith.constant 0.000000e+00 : f32
    %4 = vector.broadcast %cst : f32 to vector<2x1024xf32>
    %5 = arith.cmpf ogt, %3, %4 : vector<2x1024xf32>
    %cst_2 = arith.constant 0.00999999977 : f32
    %6 = vector.broadcast %cst_2 : f32 to vector<2x1024xf32>
    %7 = arith.mulf %3, %6 : vector<2x1024xf32>
    %8 = arith.select %5, %3, %7 : vector<2x1024xi1>, vector<2x1024xf32>
    %c0_3 = arith.constant 0 : index
    %c0_4 = arith.constant 0 : index
    %9 = vector.load %arg3[%c0_3, %c0_4] : memref<2x1024xf32, #tpu.memory_space<vmem>>, vector<2x1024xf32>
    tpu.vector_store %arg3[%c0_3, %c0_4], %8 {strides = array<i32>} : memref<2x1024xf32, #tpu.memory_space<vmem>>, vector<2x1024xf32>,
    %cst_5 = arith.constant 0.000000e+00 : f32
    %10 = vector.broadcast %cst_5 : f32 to vector<2x1024xf32>
    %11 = arith.cmpf ole, %3, %10 : vector<2x1024xf32>
    %c0_6 = arith.constant 0 : index
    %c0_7 = arith.constant 0 : index
    %12 = vector.load %arg4[%c0_6, %c0_7] : memref<2x1xf32, #tpu.memory_space<vmem>>, vector<2x1xf32>
    %13 = arith.extui %11 : vector<2x1024xi1> to vector<2x1024xi32>
    %14 = arith.sitofp %13 : vector<2x1024xi32> to vector<2x1024xf32>
    %cst_8 = arith.constant dense<0.000000e+00> : vector<2xf32>
    %15 = vector.multi_reduction <add>, %14, %cst_8 [1] : vector<2x1024xf32> to vector<2xf32>
    %16 = vector.shape_cast %15 : vector<2xf32> to vector<2x1xf32>
    %17 = arith.addf %12, %16 : vector<2x1xf32>
    %c0_9 = arith.constant 0 : index
    %c0_10 = arith.constant 0 : index
    %18 = vector.load %arg4[%c0_9, %c0_10] : memref<2x1xf32, #tpu.memory_space<vmem>>, vector<2x1xf32>
    tpu.vector_store %arg4[%c0_9, %c0_10], %17 {strides = array<i32>} : memref<2x1xf32, #tpu.memory_space<vmem>>, vector<2x1xf32>,
    %c0_i32_11 = arith.constant 0 : i32
    %19 = arith.cmpi eq, %arg1, %c0_i32_11 : i32
    %20 = arith.extui %19 : i1 to i32
    %c0_i32_12 = arith.constant 0 : i32
    %21 = arith.cmpi ne, %20, %c0_i32_12 : i32
    scf.if %21 {
      %c0_13 = arith.constant 0 : index
      %c0_14 = arith.constant 0 : index
      %22 = vector.load %arg4[%c0_13, %c0_14] : memref<2x1xf32, #tpu.memory_space<vmem>>, vector<2x1xf32>
      %cst_15 = arith.constant -4.60517025 : f32
      %23 = vector.broadcast %cst_15 : f32 to vector<2x1xf32>
      %24 = arith.mulf %22, %23 : vector<2x1xf32>
      %c0_16 = arith.constant 0 : index
      %c0_17 = arith.constant 0 : index
      %25 = vector.load %arg4[%c0_16, %c0_17] : memref<2x1xf32, #tpu.memory_space<vmem>>, vector<2x1xf32>
      tpu.vector_store %arg4[%c0_16, %c0_17], %24 {strides = array<i32>} : memref<2x1xf32, #tpu.memory_space<vmem>>, vector<2x1xf32>,
    } else {
    }
    return
  }
  func.func @transform_0(%arg0: i32, %arg1: i32) -> (i32, i32) {
    %c0_i32 = arith.constant 0 : i32
    return %arg0, %arg1 : i32, i32
  }
  func.func @transform_1(%arg0: i32, %arg1: i32) -> (i32, i32) {
    %c0_i32 = arith.constant 0 : i32
    return %arg0, %arg1 : i32, i32
  }
  func.func @transform_2(%arg0: i32, %arg1: i32) -> (i32, i32) {
    %c0_i32 = arith.constant 0 : i32
    %c0_i32_0 = arith.constant 0 : i32
    return %arg0, %c0_i32 : i32, i32
  }
}

</mosaic_0001>

<bundles_post_ra>
// kernel: tpu_custom_call.1
= control target key start
LH: loop header
LB: loop body
LE: loop exit
PB: predicated region body
PF: predicated region fallthrough
CT: control target
= control target key end

     0   :  { %8 = vsyncpa [#allocation3], 0  ;;  %s237_s0 = inlined_call_operand.hbm [shape: f32[2,1024], index: 0, kind: input, shape index: {}]   ;;  %s238_s1 = inlined_call_operand.hbm [shape: f32[2,1024], index: 1, kind: output, shape index: {0}]   ;;  %s239_s2 = inlined_call_operand.vmem [shape: f32[2,1], index: 2, kind: output, shape index: {1}]  }
   0x1   :  { %9 = vsyncpa [#allocation4], 0  ;;  %s186_s9 = smov [#allocation2]  }
   0x2   :  { %s16_s10 = sshll.u32 %s186_s9, 4  ;;  %s17_s10 = int_to_ptr.vmem [resolvable:$true] %s16_s10 }
   0x3   :  { %s150_s11 = scalar_lea.vmem %s17_s10, 256  ;;  %p155_p1 = scmp.lt.s32.totalorder %s17_s10, %s17_s10 }
   0x4   :  { %p151_p0 = scmp.ne.s32.totalorder %s17_s10, %s150_s11  ;;  %p156_p2 = scmp.lt.s32.totalorder %s150_s11, %s150_s11 }
   0x6   :  { %p157_p3 = por %p156_p2, %p155_p1 }
   0x8   :  { %p158_p4 = pnand %p157_p3, %p151_p0 }
   0xa   :  { %161 = shalt.err (!%p158_p4)
}
   0xb   :  { %19 = dma.hbm_to_vmem [thread:$0]  %s237_s0, 256, %s17_s10, [#allocation3]  }
   0xc   :  { %182 = dma.done.wait [#allocation3], 256  }
   0xd   :  { %183 = vsyncadd [#allocation3], 4294967040  ;;  %vm27_vm0 = vcmask 1024   ;;  %v52_v0 = vlaneseq  ;;  %v187_v1 = vmov 0.0   ;;  %v188_v2 = vmov 1983009808  }
   0xe   :  { %28 = vst.msk [vmem:[%s239_s2] sm:$0x3] %vm27_vm0, %v187_v1  ;;  %v50_v3 = vunpack.c.l.s4 %v188_v2  ;;  %v29_v7 = vld [vmem:[#allocation2] sm:$0xff]  ;;  %v30_v8 = vld [vmem:[#allocation2 + $0x8] sm:$0xff]  ;;  %vm90_vm3 = vcmask 1041408   ;;  %s189_s0 = smov [#allocation5]  }
   0xf   :  { %v53_v4 = vshrl.u32 %v52_v0, 7  ;;  %vm39_vm1 = vcmp.le.f32.partialorder %v29_v7, 0.0  ;;  %vm40_vm2 = vcmp.le.f32.partialorder %v30_v8, 0.0  ;;  %v33_v36 = vmul.f32 0.01, %v29_v7  ;;  %s123_s16 = sshll.u32 %s189_s0, 4  ;;  %s124_s16 = int_to_ptr.vmem [resolvable:$true] %s123_s16 }
  0x10   :  { %v51_v5 = vunpack.c.0.s8 %v50_v3  ;;  %v136_v9 = vsel %vm39_vm1, 1.0, %v187_v1  ;;  %v137_v10 = vsel %vm40_vm2, 1.0, %v187_v1  ;;  %v34_v37 = vmul.f32 0.01, %v30_v8  ;;  %s162_s17 = scalar_lea.vmem %s124_s16, 256  ;;  %p167_p6 = scmp.lt.s32.totalorder %s124_s16, %s124_s16 }
  0x11   :  { %v48_v11 = vcombine.high %v136_v9, %v136_v9  ;;  %v65_v15 = vcombine.high %v137_v10, %v137_v10  ;;  %vm31_vm4 = vcmp.gt.f32.partialorder %v29_v7, 0.0  ;;  %vm32_vm5 = vcmp.gt.f32.partialorder %v30_v8, 0.0  ;;  %p163_p5 = scmp.ne.s32.totalorder %s124_s16, %s162_s17  ;;  %p168_p7 = scmp.lt.s32.totalorder %s162_s17, %s162_s17 }
  0x12   :  { %v54_v6 = vsub.s32 %v51_v5, %v53_v4  ;;  %v35_v38 = vsel %vm31_vm4, %v29_v7, %v33_v36  ;;  %v36_v39 = vsel %vm32_vm5, %v30_v8, %v34_v37 }
  0x13   :  { %37 = vst [vmem:[#allocation5] sm:$0xff] %v35_v38  ;;  %38 = vst [vmem:[#allocation5 + $0x8] sm:$0xff] %v36_v39  ;;  %p169_p8 = por %p168_p7, %p167_p6 }
  0x14   :  { %v55_v12 = vrot.slane %v136_v9, %v54_v6  ;;  %v62_v13 = vrot.slane %v48_v11, %v54_v6  ;;  %v72_v16 = vrot.slane %v137_v10, %v54_v6  ;;  %v79_v22 = vrot.slane %v65_v15, %v54_v6 }
  0x15   :  { %p170_p9 = pnand %p169_p8, %p163_p5 }
  0x16   :  { %v63_v14 = vcombine.high %v55_v12, %v55_v12  ;;  %v91_v17 = vsel %vm90_vm3, %v55_v12, 0.0  ;;  %v64_v18 = vcombine.high %v62_v13, %v62_v13  ;;  %v94_v20 = vsel %vm90_vm3, %v62_v13, 0.0 }
  0x17   :  { %v80_v23 = vcombine.high %v72_v16, %v72_v16  ;;  %v98_v26 = vsel %vm90_vm3, %v72_v16, 0.0  ;;  %v81_v28 = vcombine.high %v79_v22, %v79_v22  ;;  %v102_v31 = vsel %vm90_vm3, %v79_v22, 0.0 }
  0x18   :  { %v92_v19 = vsel %vm90_vm3, %v63_v14, 0.0  ;;  %v96_v24 = vsel %vm90_vm3, %v64_v18, 0.0 }
  0x19   :  { %v93_v21 = vadd.f32 %v92_v19, %v91_v17  ;;  %v100_v29 = vsel %vm90_vm3, %v80_v23, 0.0  ;;  %v104_v33 = vsel %vm90_vm3, %v81_v28, 0.0 }
  0x1b   :  { %v95_v25 = vadd.f32 %v94_v20, %v93_v21 }
  0x1d   :  { %v97_v27 = vadd.f32 %v96_v24, %v95_v25 }
  0x1f   :  { %v99_v30 = vadd.f32 %v98_v26, %v97_v27 }
  0x21   :  { %v101_v32 = vadd.f32 %v100_v29, %v99_v30 }
  0x23   :  { %v103_v34 = vadd.f32 %v102_v31, %v101_v32 }
  0x25   :  { %v105_v35 = vadd.f32 %v104_v33, %v103_v34 }
  0x27   :  { %106 = vadd.xlane.f32.xlu0 %v105_v35 }
  0x28   :  { %173 = shalt.err (!%p170_p9)
}
  0x29   :  { %126 = dma.vmem_to_hbm [thread:$0]  %s124_s16, 256, %s238_s1, [#allocation4]   ;;  %v41_v40 = vld [vmem:[%s239_s2] sm:$0x3] }
  0xb0   :  { %v107_v41 = vpop.xlane.xlu0 %106 }
  0xb1   :  { %v108_v42 = vadd.f32 %v107_v41, %v41_v40 }
  0xb3   :  { %110 = vst.msk [vmem:[%s239_s2] sm:$0x3] %vm27_vm0, %v108_v42 }
  0xba   :  { %v114_v43 = vld [vmem:[%s239_s2] sm:$0x3] }
  0xbb   :  { %v115_v44 = vmul.f32 -4.6051702, %v114_v43 }
  0xbd   :  { %116 = vst.msk [vmem:[%s239_s2] sm:$0x3] %vm27_vm0, %v115_v44 }
  0xbe   :  { %184 = dma.done.wait [#allocation4], 256  }
  0xbf   :  { %185 = vsyncadd [#allocation4], 4294967040 }
  0xc0   :  { %134 = vsyncpa [#allocation3], 1 }
  0xc1   :  { %135 = vsyncpa [#allocation4], 1 }

</bundles_post_ra>
